<compile_context>
chip_gen: v7x
topology: tpu7x:2x2x1
jax: 0.10.0
libtpu: 0.0.40
codegen_flags: <defaults>
</compile_context>

<pallas_src>
import functools

import jax
import jax.numpy as jnp
from jax.experimental import pallas as pl
from jax.experimental.pallas import tpu as pltpu


def _round_up(x, m):
    return (x + m - 1) // m * m


# ----------------------------------------------------------------------------
# Fused kernel: one image per grid step.
#   x_ref    : (1, Cin, L_IN)  f32   zero-halo'd, lane-flattened input
#   mask_ref : (1, L_IN)       f32   1.0 exactly at real (non-halo) pixels
#   w*_ref   : folded-BN weights, pre-transposed to (Cout, Cin), bf16
#   b*_ref   : folded-BN biases, (Cout, 1), f32
#   o_ref    : (1, Cout, L_OUT) f32  output in the same flat layout
#   h1_ref   : VMEM (MID, L_IN) f32  conv1 output (with zero halo)
#   acc_ref  : VMEM (MID, L_OUT) f32 conv2 accumulator
# ----------------------------------------------------------------------------
def _fused_block_kernel(x_ref, mask_ref, w1_ref, b1_ref, w2_ref, b2_ref,
                        w3_ref, b3_ref, ws_ref, bs_ref, o_ref,
                        h1_ref, acc_ref, *, wp, l_out):
    x = x_ref[0]                                  # (Cin, L_IN) f32
    mask = mask_ref[...]                          # (1,   L_IN) f32

    # --- conv1 (1x1) + folded BN + ReLU; mask re-zeroes the 3x3 halo --------
    h1 = jnp.dot(w1_ref[...], x.astype(jnp.bfloat16),
                 preferred_element_type=jnp.float32)
    h1 = jnp.maximum(h1 + b1_ref[...], 0.0) * mask
    h1_ref[...] = h1

    # --- conv2 (3x3, pad 1): 9 lane-shifted matmuls, VMEM accumulator -------
    for kh in range(3):
        for kw in range(3):
            off = kh * wp + kw
            tap = h1_ref[:, off:off + l_out].astype(jnp.bfloat16)
            part = jnp.dot(w2_ref[kh * 3 + kw], tap,
                           preferred_element_type=jnp.float32)
            if off == 0:
                acc_ref[...] = part
            else:
                acc_ref[...] += part
    h2 = jnp.maximum(acc_ref[...] + b2_ref[...], 0.0).astype(jnp.bfloat16)

    # --- conv3 (1x1) + folded BN + ReLU --------------------------------------
    y = jnp.dot(w3_ref[...], h2, preferred_element_type=jnp.float32)
    y = jnp.maximum(y + b3_ref[...], 0.0)

    # --- skip path: 1x1 conv + BN + ReLU on the same output pixels ----------
    xs = x_ref[0, :, wp + 1:wp + 1 + l_out].astype(jnp.bfloat16)
    s = jnp.dot(ws_ref[...], xs, preferred_element_type=jnp.float32)
    s = jnp.maximum(s + bs_ref[...], 0.0)

    # --- residual add + lane-dense store -------------------------------------
    o_ref[0, :, :] = (y + s).astype(o_ref.dtype)


# ----------------------------------------------------------------------------
# Weight prep: fold BN scale into the conv weight, transpose to (Cout, Cin).
# ----------------------------------------------------------------------------
def _prep_1x1(p):
    w_t = (p["w"] * p["scale"][None, :]).T.astype(jnp.bfloat16)   # (Cout, Cin)
    b = p["bias"][:, None].astype(jnp.float32)                    # (Cout, 1)
    return w_t, b


def _prep_3x3(p):
    w = p["w"] * p["scale"][None, None, None, :]                  # (3,3,Cin,Cout)
    cin, cout = w.shape[2], w.shape[3]
    w_t = jnp.transpose(w, (0, 1, 3, 2)).reshape(9, cout, cin).astype(jnp.bfloat16)
    b = p["bias"][:, None].astype(jnp.float32)
    return w_t, b


# ----------------------------------------------------------------------------
# ResidualBlock forward (NCHW in, NCHW out).
# ----------------------------------------------------------------------------
@functools.partial(jax.jit, static_argnames=("downsample",))
def residual_block_forward(x_nchw, params, downsample=False):
    stride = 2 if downsample else 1
    x = x_nchw[:, :, ::stride, ::stride] if stride > 1 else x_nchw
    n, cin, ho, wo = x.shape
    mid = params["conv1"]["w"].shape[1]
    cout = params["conv3"]["w"].shape[1]

    wp = wo + 2                                   # halo-padded width
    l1 = (ho + 2) * wp                            # halo'd flattened spatial size
    l_out = _round_up(ho * wp, 128)               # lane extent of outputs
    l_in = _round_up(l_out + 2 * wp + 2, 128)     # lane extent of inputs (tap room)

    # zero-halo spatially, flatten HW onto the lane axis, pad lanes.
    xp = jnp.pad(x, ((0, 0), (0, 0), (1, 1), (1, 1))).reshape(n, cin, l1)
    xf = jnp.pad(xp, ((0, 0), (0, 0), (0, l_in - l1))).astype(jnp.float32)

    # 1.0 exactly at flat positions holding a real pixel (conv2 halo must be 0).
    lidx = jnp.arange(l_in)
    r, c = lidx // wp, lidx % wp
    mask = ((r >= 1) & (r <= ho) & (c >= 1) & (c <= wo) & (lidx < l1))
    mask = mask.astype(jnp.float32)[None, :]

    w1_t, b1 = _prep_1x1(params["conv1"])
    w2_t, b2 = _prep_3x3(params["conv2"])
    w3_t, b3 = _prep_1x1(params["conv3"])
    ws_t, bs = _prep_1x1(params["skip"])

    kernel = functools.partial(_fused_block_kernel, wp=wp, l_out=l_out)
    out_flat = pl.pallas_call(
        kernel,
        out_shape=jax.ShapeDtypeStruct((n, cout, l_out), jnp.float32),
        grid=(n,),
        in_specs=[
            pl.BlockSpec((1, cin, l_in), lambda i: (i, 0, 0)),
            pl.BlockSpec((1, l_in), lambda i: (0, 0)),
            pl.BlockSpec((mid, cin), lambda i: (0, 0)),
            pl.BlockSpec((mid, 1), lambda i: (0, 0)),
            pl.BlockSpec((9, mid, mid), lambda i: (0, 0, 0)),
            pl.BlockSpec((mid, 1), lambda i: (0, 0)),
            pl.BlockSpec((cout, mid), lambda i: (0, 0)),
            pl.BlockSpec((cout, 1), lambda i: (0, 0)),
            pl.BlockSpec((cout, cin), lambda i: (0, 0)),
            pl.BlockSpec((cout, 1), lambda i: (0, 0)),
        ],
        out_specs=pl.BlockSpec((1, cout, l_out), lambda i: (i, 0, 0)),
        scratch_shapes=[
            pltpu.VMEM((mid, l_in), jnp.float32),    # conv1 output (halo'd)
            pltpu.VMEM((mid, l_out), jnp.float32),   # conv2 accumulator
        ],
        compiler_params=pltpu.CompilerParams(
            dimension_semantics=("parallel",),
            vmem_limit_bytes=32 * 1024 * 1024,
        ),
    )(xf, mask, w1_t, b1, w2_t, b2, w3_t, b3, ws_t, bs)

    # valid output pixel (h, w) lives at flat lane position h*Wp + w.
    y = out_flat[:, :, :ho * wp].reshape(n, cout, ho, wp)[:, :, :, :wo]
    return y


# ----------------------------------------------------------------------------
# BN folding + synthetic parameter construction (deterministic).
# ----------------------------------------------------------------------------
def _fold_bn(conv_bias, gamma, beta, mean, var, eps=1e-5):
    scale = gamma / jnp.sqrt(var + eps)
    bias = (conv_bias - mean) * scale + beta
    return scale, bias


def _make_conv_bn_params(key, cin, cout, ksize):
    kw, kb, kg, kbe, km, kv = jax.random.split(key, 6)
    if ksize == 1:
        w = 0.1 * jax.random.normal(kw, (cin, cout), jnp.float32)
    else:
        w = 0.1 * jax.random.normal(kw, (ksize, ksize, cin, cout), jnp.float32)
    conv_b = 0.1 * jax.random.normal(kb, (cout,), jnp.float32)
    gamma = jax.random.uniform(kg, (cout,), jnp.float32, 0.5, 1.5)
    beta = 0.1 * jax.random.normal(kbe, (cout,), jnp.float32)
    mean = 0.1 * jax.random.normal(km, (cout,), jnp.float32)
    var = jax.random.uniform(kv, (cout,), jnp.float32, 0.5, 1.5)
    scale, bias = _fold_bn(conv_b, gamma, beta, mean, var)
    return {"w": w, "scale": scale, "bias": bias}


def make_residual_block_params(key, in_ch, mid_ch, out_ch):
    k1, k2, k3, ks = jax.random.split(key, 4)
    return {
        "conv1": _make_conv_bn_params(k1, in_ch, mid_ch, 1),
        "conv2": _make_conv_bn_params(k2, mid_ch, mid_ch, 3),
        "conv3": _make_conv_bn_params(k3, mid_ch, out_ch, 1),
        "skip": _make_conv_bn_params(ks, in_ch, out_ch, 1),
    }


# ----------------------------------------------------------------------------
# Pure-JAX f32 reference (same folded-BN convention) for a sanity check.
# ----------------------------------------------------------------------------
def _reference_forward(x_nchw, params, downsample=False):
    stride = 2 if downsample else 1
    x = x_nchw[:, :, ::stride, ::stride] if stride > 1 else x_nchw

    def pw(h, p):
        y = jnp.einsum("nchw,cd->ndhw", h, p["w"])
        y = y * p["scale"][None, :, None, None] + p["bias"][None, :, None, None]
        return jnp.maximum(y, 0.0)

    def c3(h, p):
        n, c, hh, ww = h.shape
        hp = jnp.pad(h, ((0, 0), (0, 0), (1, 1), (1, 1)))
        y = jnp.zeros((n, p["w"].shape[-1], hh, ww), jnp.float32)
        for kh in range(3):
            for kw in range(3):
                y = y + jnp.einsum("nchw,cd->ndhw",
                                   hp[:, :, kh:kh + hh, kw:kw + ww],
                                   p["w"][kh, kw])
        y = y * p["scale"][None, :, None, None] + p["bias"][None, :, None, None]
        return jnp.maximum(y, 0.0)

    h = pw(x, params["conv1"])
    h = c3(h, params["conv2"])
    out = pw(h, params["conv3"])
    skip = pw(x, params["skip"])
    return out + skip


if __name__ == "__main__":
    key = jax.random.PRNGKey(0)
    kx, kp = jax.random.split(key)

    N, C_IN, MID, C_OUT, H, W = 2, 4, 8, 16, 16, 16
    x = jax.random.normal(kx, (N, C_IN, H, W), jnp.float32)
    params = make_residual_block_params(kp, C_IN, MID, C_OUT)

    y = residual_block_forward(x, params, downsample=False)
    jax.block_until_ready(y)
    assert y.shape == (N, C_OUT, H, W), y.shape

    # Loose-tolerance sanity check vs. f32 XLA reference (kernel uses bf16 MXU).
    y_ref = _reference_forward(x, params, downsample=False)
    err = float(jnp.max(jnp.abs(y - y_ref)))
    ref_scale = float(jnp.maximum(jnp.max(jnp.abs(y_ref)), 1.0))
    assert err / ref_scale < 1e-1, (err, ref_scale)

    print("KERNEL_OK")
</pallas_src>

<mosaic_0001>
module attributes {stable_mosaic.version = 11 : i64} {
  func.func @_fused_block_kernel(%arg0: i32, %arg1: memref<1x4x512xf32, #tpu.memory_space<vmem>>, %arg2: memref<1x512xf32, #tpu.memory_space<vmem>>, %arg3: memref<8x4xbf16, #tpu.memory_space<vmem>>, %arg4: memref<8x1xf32, #tpu.memory_space<vmem>>, %arg5: memref<9x8x8xbf16, #tpu.memory_space<vmem>>, %arg6: memref<8x1xf32, #tpu.memory_space<vmem>>, %arg7: memref<16x8xbf16, #tpu.memory_space<vmem>>, %arg8: memref<16x1xf32, #tpu.memory_space<vmem>>, %arg9: memref<16x4xbf16, #tpu.memory_space<vmem>>, %arg10: memref<16x1xf32, #tpu.memory_space<vmem>>, %arg11: memref<1x16x384xf32, #tpu.memory_space<vmem>>, %arg12: memref<8x512xf32, #tpu.memory_space<vmem>>, %arg13: memref<8x384xf32, #tpu.memory_space<vmem>>) attributes {dimension_semantics = [#tpu.dimension_semantics<parallel>], iteration_bounds = array<i64: 2>, scalar_prefetch = 0 : i64, scratch_operands = 2 : i64, tpu.core_type = #tpu.core_type<tc>, window_params = [{transform_indices = @transform_0, window_bounds = array<i64: 1, 4, 512>}, {pipeline_mode = #tpu.pipeline_mode<synchronous>, transform_indices = @transform_1, window_bounds = array<i64: 1, 512>}, {pipeline_mode = #tpu.pipeline_mode<synchronous>, transform_indices = @transform_2, window_bounds = array<i64: 8, 4>}, {pipeline_mode = #tpu.pipeline_mode<synchronous>, transform_indices = @transform_3, window_bounds = array<i64: 8, 1>}, {pipeline_mode = #tpu.pipeline_mode<synchronous>, transform_indices = @transform_4, window_bounds = array<i64: 9, 8, 8>}, {pipeline_mode = #tpu.pipeline_mode<synchronous>, transform_indices = @transform_5, window_bounds = array<i64: 8, 1>}, {pipeline_mode = #tpu.pipeline_mode<synchronous>, transform_indices = @transform_6, window_bounds = array<i64: 16, 8>}, {pipeline_mode = #tpu.pipeline_mode<synchronous>, transform_indices = @transform_7, window_bounds = array<i64: 16, 1>}, {pipeline_mode = #tpu.pipeline_mode<synchronous>, transform_indices = @transform_8, window_bounds = array<i64: 16, 4>}, {pipeline_mode = #tpu.pipeline_mode<synchronous>, transform_indices = @transform_9, window_bounds = array<i64: 16, 1>}, {transform_indices = @transform_10, window_bounds = array<i64: 1, 16, 384>}]} {
    %c0 = arith.constant 0 : index
    %c0_0 = arith.constant 0 : index
    %c0_1 = arith.constant 0 : index
    %0 = vector.load %arg1[%c0, %c0_0, %c0_1] : memref<1x4x512xf32, #tpu.memory_space<vmem>>, vector<1x4x512xf32>
    %1 = vector.shape_cast %0 : vector<1x4x512xf32> to vector<4x512xf32>
    %c0_2 = arith.constant 0 : index
    %c0_3 = arith.constant 0 : index
    %2 = vector.load %arg2[%c0_2, %c0_3] : memref<1x512xf32, #tpu.memory_space<vmem>>, vector<1x512xf32>
    %c0_4 = arith.constant 0 : index
    %c0_5 = arith.constant 0 : index
    %3 = vector.load %arg3[%c0_4, %c0_5] : memref<8x4xbf16, #tpu.memory_space<vmem>>, vector<8x4xbf16>
    %4 = arith.truncf %1 : vector<4x512xf32> to vector<4x512xbf16>
    %cst = arith.constant dense<0.000000e+00> : vector<8x512xf32>
    %5 = tpu.matmul %3, %4, %cst {dimension_numbers = #tpu.dot_dimension_numbers<[1], [0], [0], [1], [0, 0, 1, 1], [], []>} : vector<8x4xbf16>, vector<4x512xbf16>, vector<8x512xf32> -> vector<8x512xf32>
    %c0_6 = arith.constant 0 : index
    %c0_7 = arith.constant 0 : index
    %6 = vector.load %arg4[%c0_6, %c0_7] : memref<8x1xf32, #tpu.memory_space<vmem>>, vector<8x1xf32>
    %7 = vector.broadcast %6 : vector<8x1xf32> to vector<8x512xf32>
    %8 = arith.addf %5, %7 : vector<8x512xf32>
    %cst_8 = arith.constant 0.000000e+00 : f32
    %9 = vector.broadcast %cst_8 : f32 to vector<8x512xf32>
    %10 = arith.maximumf %8, %9 : vector<8x512xf32>
    %11 = vector.broadcast %2 : vector<1x512xf32> to vector<8x512xf32>
    %12 = arith.mulf %10, %11 : vector<8x512xf32>
    %c0_9 = arith.constant 0 : index
    %c0_10 = arith.constant 0 : index
    %13 = vector.load %arg12[%c0_9, %c0_10] : memref<8x512xf32, #tpu.memory_space<vmem>>, vector<8x512xf32>
    tpu.vector_store %arg12[%c0_9, %c0_10], %12 {strides = array<i32>} : memref<8x512xf32, #tpu.memory_space<vmem>>, vector<8x512xf32>,
    %c0_11 = arith.constant 0 : index
    %c0_12 = arith.constant 0 : index
    %14 = vector.load %arg12[%c0_11, %c0_12] : memref<8x512xf32, #tpu.memory_space<vmem>>, vector<8x384xf32>
    %15 = arith.truncf %14 : vector<8x384xf32> to vector<8x384xbf16>
    %c0_13 = arith.constant 0 : index
    %c0_14 = arith.constant 0 : index
    %c0_15 = arith.constant 0 : index
    %16 = vector.load %arg5[%c0_13, %c0_14, %c0_15] : memref<9x8x8xbf16, #tpu.memory_space<vmem>>, vector<1x8x8xbf16>
    %17 = vector.shape_cast %16 : vector<1x8x8xbf16> to vector<8x8xbf16>
    %cst_16 = arith.constant dense<0.000000e+00> : vector<8x384xf32>
    %18 = tpu.matmul %17, %15, %cst_16 {dimension_numbers = #tpu.dot_dimension_numbers<[1], [0], [0], [1], [0, 0, 1, 1], [], []>} : vector<8x8xbf16>, vector<8x384xbf16>, vector<8x384xf32> -> vector<8x384xf32>
    %c0_17 = arith.constant 0 : index
    %c0_18 = arith.constant 0 : index
    %19 = vector.load %arg13[%c0_17, %c0_18] : memref<8x384xf32, #tpu.memory_space<vmem>>, vector<8x384xf32>
    tpu.vector_store %arg13[%c0_17, %c0_18], %18 {strides = array<i32>} : memref<8x384xf32, #tpu.memory_space<vmem>>, vector<8x384xf32>,
    %c0_19 = arith.constant 0 : index
    %c1 = arith.constant 1 : index
    %20 = vector.load %arg12[%c0_19, %c1] : memref<8x512xf32, #tpu.memory_space<vmem>>, vector<8x384xf32>
    %21 = arith.truncf %20 : vector<8x384xf32> to vector<8x384xbf16>
    %c1_20 = arith.constant 1 : index
    %c0_21 = arith.constant 0 : index
    %c0_22 = arith.constant 0 : index
    %22 = vector.load %arg5[%c1_20, %c0_21, %c0_22] : memref<9x8x8xbf16, #tpu.memory_space<vmem>>, vector<1x8x8xbf16>
    %23 = vector.shape_cast %22 : vector<1x8x8xbf16> to vector<8x8xbf16>
    %cst_23 = arith.constant dense<0.000000e+00> : vector<8x384xf32>
    %24 = tpu.matmul %23, %21, %cst_23 {dimension_numbers = #tpu.dot_dimension_numbers<[1], [0], [0], [1], [0, 0, 1, 1], [], []>} : vector<8x8xbf16>, vector<8x384xbf16>, vector<8x384xf32> -> vector<8x384xf32>
    %c0_24 = arith.constant 0 : index
    %c0_25 = arith.constant 0 : index
    %25 = vector.load %arg13[%c0_24, %c0_25] : memref<8x384xf32, #tpu.memory_space<vmem>>, vector<8x384xf32>
    %26 = arith.addf %25, %24 : vector<8x384xf32>
    %c0_26 = arith.constant 0 : index
    %c0_27 = arith.constant 0 : index
    %27 = vector.load %arg13[%c0_26, %c0_27] : memref<8x384xf32, #tpu.memory_space<vmem>>, vector<8x384xf32>
    tpu.vector_store %arg13[%c0_26, %c0_27], %26 {strides = array<i32>} : memref<8x384xf32, #tpu.memory_space<vmem>>, vector<8x384xf32>,
    %c0_28 = arith.constant 0 : index
    %c2 = arith.constant 2 : index
    %28 = vector.load %arg12[%c0_28, %c2] : memref<8x512xf32, #tpu.memory_space<vmem>>, vector<8x384xf32>
    %29 = arith.truncf %28 : vector<8x384xf32> to vector<8x384xbf16>
    %c2_29 = arith.constant 2 : index
    %c0_30 = arith.constant 0 : index
    %c0_31 = arith.constant 0 : index
    %30 = vector.load %arg5[%c2_29, %c0_30, %c0_31] : memref<9x8x8xbf16, #tpu.memory_space<vmem>>, vector<1x8x8xbf16>
    %31 = vector.shape_cast %30 : vector<1x8x8xbf16> to vector<8x8xbf16>
    %cst_32 = arith.constant dense<0.000000e+00> : vector<8x384xf32>
    %32 = tpu.matmul %31, %29, %cst_32 {dimension_numbers = #tpu.dot_dimension_numbers<[1], [0], [0], [1], [0, 0, 1, 1], [], []>} : vector<8x8xbf16>, vector<8x384xbf16>, vector<8x384xf32> -> vector<8x384xf32>
    %c0_33 = arith.constant 0 : index
    %c0_34 = arith.constant 0 : index
    %33 = vector.load %arg13[%c0_33, %c0_34] : memref<8x384xf32, #tpu.memory_space<vmem>>, vector<8x384xf32>
    %34 = arith.addf %33, %32 : vector<8x384xf32>
    %c0_35 = arith.constant 0 : index
    %c0_36 = arith.constant 0 : index
    %35 = vector.load %arg13[%c0_35, %c0_36] : memref<8x384xf32, #tpu.memory_space<vmem>>, vector<8x384xf32>
    tpu.vector_store %arg13[%c0_35, %c0_36], %34 {strides = array<i32>} : memref<8x384xf32, #tpu.memory_space<vmem>>, vector<8x384xf32>,
    %c0_37 = arith.constant 0 : index
    %c18 = arith.constant 18 : index
    %36 = vector.load %arg12[%c0_37, %c18] : memref<8x512xf32, #tpu.memory_space<vmem>>, vector<8x384xf32>
    %37 = arith.truncf %36 : vector<8x384xf32> to vector<8x384xbf16>
    %c3 = arith.constant 3 : index
    %c0_38 = arith.constant 0 : index
    %c0_39 = arith.constant 0 : index
    %38 = vector.load %arg5[%c3, %c0_38, %c0_39] : memref<9x8x8xbf16, #tpu.memory_space<vmem>>, vector<1x8x8xbf16>
    %39 = vector.shape_cast %38 : vector<1x8x8xbf16> to vector<8x8xbf16>
    %cst_40 = arith.constant dense<0.000000e+00> : vector<8x384xf32>
    %40 = tpu.matmul %39, %37, %cst_40 {dimension_numbers = #tpu.dot_dimension_numbers<[1], [0], [0], [1], [0, 0, 1, 1], [], []>} : vector<8x8xbf16>, vector<8x384xbf16>, vector<8x384xf32> -> vector<8x384xf32>
    %c0_41 = arith.constant 0 : index
    %c0_42 = arith.constant 0 : index
    %41 = vector.load %arg13[%c0_41, %c0_42] : memref<8x384xf32, #tpu.memory_space<vmem>>, vector<8x384xf32>
    %42 = arith.addf %41, %40 : vector<8x384xf32>
    %c0_43 = arith.constant 0 : index
    %c0_44 = arith.constant 0 : index
    %43 = vector.load %arg13[%c0_43, %c0_44] : memref<8x384xf32, #tpu.memory_space<vmem>>, vector<8x384xf32>
    tpu.vector_store %arg13[%c0_43, %c0_44], %42 {strides = array<i32>} : memref<8x384xf32, #tpu.memory_space<vmem>>, vector<8x384xf32>,
    %c0_45 = arith.constant 0 : index
    %c19 = arith.constant 19 : index
    %44 = vector.load %arg12[%c0_45, %c19] : memref<8x512xf32, #tpu.memory_space<vmem>>, vector<8x384xf32>
    %45 = arith.truncf %44 : vector<8x384xf32> to vector<8x384xbf16>
    %c4 = arith.constant 4 : index
    %c0_46 = arith.constant 0 : index
    %c0_47 = arith.constant 0 : index
    %46 = vector.load %arg5[%c4, %c0_46, %c0_47] : memref<9x8x8xbf16, #tpu.memory_space<vmem>>, vector<1x8x8xbf16>
    %47 = vector.shape_cast %46 : vector<1x8x8xbf16> to vector<8x8xbf16>
    %cst_48 = arith.constant dense<0.000000e+00> : vector<8x384xf32>
    %48 = tpu.matmul %47, %45, %cst_48 {dimension_numbers = #tpu.dot_dimension_numbers<[1], [0], [0], [1], [0, 0, 1, 1], [], []>} : vector<8x8xbf16>, vector<8x384xbf16>, vector<8x384xf32> -> vector<8x384xf32>
    %c0_49 = arith.constant 0 : index
    %c0_50 = arith.constant 0 : index
    %49 = vector.load %arg13[%c0_49, %c0_50] : memref<8x384xf32, #tpu.memory_space<vmem>>, vector<8x384xf32>
    %50 = arith.addf %49, %48 : vector<8x384xf32>
    %c0_51 = arith.constant 0 : index
    %c0_52 = arith.constant 0 : index
    %51 = vector.load %arg13[%c0_51, %c0_52] : memref<8x384xf32, #tpu.memory_space<vmem>>, vector<8x384xf32>
    tpu.vector_store %arg13[%c0_51, %c0_52], %50 {strides = array<i32>} : memref<8x384xf32, #tpu.memory_space<vmem>>, vector<8x384xf32>,
    %c0_53 = arith.constant 0 : index
    %c20 = arith.constant 20 : index
    %52 = vector.load %arg12[%c0_53, %c20] : memref<8x512xf32, #tpu.memory_space<vmem>>, vector<8x384xf32>
    %53 = arith.truncf %52 : vector<8x384xf32> to vector<8x384xbf16>
    %c5 = arith.constant 5 : index
    %c0_54 = arith.constant 0 : index
    %c0_55 = arith.constant 0 : index
    %54 = vector.load %arg5[%c5, %c0_54, %c0_55] : memref<9x8x8xbf16, #tpu.memory_space<vmem>>, vector<1x8x8xbf16>
    %55 = vector.shape_cast %54 : vector<1x8x8xbf16> to vector<8x8xbf16>
    %cst_56 = arith.constant dense<0.000000e+00> : vector<8x384xf32>
    %56 = tpu.matmul %55, %53, %cst_56 {dimension_numbers = #tpu.dot_dimension_numbers<[1], [0], [0], [1], [0, 0, 1, 1], [], []>} : vector<8x8xbf16>, vector<8x384xbf16>, vector<8x384xf32> -> vector<8x384xf32>
    %c0_57 = arith.constant 0 : index
    %c0_58 = arith.constant 0 : index
    %57 = vector.load %arg13[%c0_57, %c0_58] : memref<8x384xf32, #tpu.memory_space<vmem>>, vector<8x384xf32>
    %58 = arith.addf %57, %56 : vector<8x384xf32>
    %c0_59 = arith.constant 0 : index
    %c0_60 = arith.constant 0 : index
    %59 = vector.load %arg13[%c0_59, %c0_60] : memref<8x384xf32, #tpu.memory_space<vmem>>, vector<8x384xf32>
    tpu.vector_store %arg13[%c0_59, %c0_60], %58 {strides = array<i32>} : memref<8x384xf32, #tpu.memory_space<vmem>>, vector<8x384xf32>,
    %c0_61 = arith.constant 0 : index
    %c36 = arith.constant 36 : index
    %60 = vector.load %arg12[%c0_61, %c36] : memref<8x512xf32, #tpu.memory_space<vmem>>, vector<8x384xf32>
    %61 = arith.truncf %60 : vector<8x384xf32> to vector<8x384xbf16>
    %c6 = arith.constant 6 : index
    %c0_62 = arith.constant 0 : index
    %c0_63 = arith.constant 0 : index
    %62 = vector.load %arg5[%c6, %c0_62, %c0_63] : memref<9x8x8xbf16, #tpu.memory_space<vmem>>, vector<1x8x8xbf16>
    %63 = vector.shape_cast %62 : vector<1x8x8xbf16> to vector<8x8xbf16>
    %cst_64 = arith.constant dense<0.000000e+00> : vector<8x384xf32>
    %64 = tpu.matmul %63, %61, %cst_64 {dimension_numbers = #tpu.dot_dimension_numbers<[1], [0], [0], [1], [0, 0, 1, 1], [], []>} : vector<8x8xbf16>, vector<8x384xbf16>, vector<8x384xf32> -> vector<8x384xf32>
    %c0_65 = arith.constant 0 : index
    %c0_66 = arith.constant 0 : index
    %65 = vector.load %arg13[%c0_65, %c0_66] : memref<8x384xf32, #tpu.memory_space<vmem>>, vector<8x384xf32>
    %66 = arith.addf %65, %64 : vector<8x384xf32>
    %c0_67 = arith.constant 0 : index
    %c0_68 = arith.constant 0 : index
    %67 = vector.load %arg13[%c0_67, %c0_68] : memref<8x384xf32, #tpu.memory_space<vmem>>, vector<8x384xf32>
    tpu.vector_store %arg13[%c0_67, %c0_68], %66 {strides = array<i32>} : memref<8x384xf32, #tpu.memory_space<vmem>>, vector<8x384xf32>,
    %c0_69 = arith.constant 0 : index
    %c37 = arith.constant 37 : index
    %68 = vector.load %arg12[%c0_69, %c37] : memref<8x512xf32, #tpu.memory_space<vmem>>, vector<8x384xf32>
    %69 = arith.truncf %68 : vector<8x384xf32> to vector<8x384xbf16>
    %c7 = arith.constant 7 : index
    %c0_70 = arith.constant 0 : index
    %c0_71 = arith.constant 0 : index
    %70 = vector.load %arg5[%c7, %c0_70, %c0_71] : memref<9x8x8xbf16, #tpu.memory_space<vmem>>, vector<1x8x8xbf16>
    %71 = vector.shape_cast %70 : vector<1x8x8xbf16> to vector<8x8xbf16>
    %cst_72 = arith.constant dense<0.000000e+00> : vector<8x384xf32>
    %72 = tpu.matmul %71, %69, %cst_72 {dimension_numbers = #tpu.dot_dimension_numbers<[1], [0], [0], [1], [0, 0, 1, 1], [], []>} : vector<8x8xbf16>, vector<8x384xbf16>, vector<8x384xf32> -> vector<8x384xf32>
    %c0_73 = arith.constant 0 : index
    %c0_74 = arith.constant 0 : index
    %73 = vector.load %arg13[%c0_73, %c0_74] : memref<8x384xf32, #tpu.memory_space<vmem>>, vector<8x384xf32>
    %74 = arith.addf %73, %72 : vector<8x384xf32>
    %c0_75 = arith.constant 0 : index
    %c0_76 = arith.constant 0 : index
    %75 = vector.load %arg13[%c0_75, %c0_76] : memref<8x384xf32, #tpu.memory_space<vmem>>, vector<8x384xf32>
    tpu.vector_store %arg13[%c0_75, %c0_76], %74 {strides = array<i32>} : memref<8x384xf32, #tpu.memory_space<vmem>>, vector<8x384xf32>,
    %c0_77 = arith.constant 0 : index
    %c38 = arith.constant 38 : index
    %76 = vector.load %arg12[%c0_77, %c38] : memref<8x512xf32, #tpu.memory_space<vmem>>, vector<8x384xf32>
    %77 = arith.truncf %76 : vector<8x384xf32> to vector<8x384xbf16>
    %c8 = arith.constant 8 : index
    %c0_78 = arith.constant 0 : index
    %c0_79 = arith.constant 0 : index
    %78 = vector.load %arg5[%c8, %c0_78, %c0_79] : memref<9x8x8xbf16, #tpu.memory_space<vmem>>, vector<1x8x8xbf16>
    %79 = vector.shape_cast %78 : vector<1x8x8xbf16> to vector<8x8xbf16>
    %cst_80 = arith.constant dense<0.000000e+00> : vector<8x384xf32>
    %80 = tpu.matmul %79, %77, %cst_80 {dimension_numbers = #tpu.dot_dimension_numbers<[1], [0], [0], [1], [0, 0, 1, 1], [], []>} : vector<8x8xbf16>, vector<8x384xbf16>, vector<8x384xf32> -> vector<8x384xf32>
    %c0_81 = arith.constant 0 : index
    %c0_82 = arith.constant 0 : index
    %81 = vector.load %arg13[%c0_81, %c0_82] : memref<8x384xf32, #tpu.memory_space<vmem>>, vector<8x384xf32>
    %82 = arith.addf %81, %80 : vector<8x384xf32>
    %c0_83 = arith.constant 0 : index
    %c0_84 = arith.constant 0 : index
    %83 = vector.load %arg13[%c0_83, %c0_84] : memref<8x384xf32, #tpu.memory_space<vmem>>, vector<8x384xf32>
    tpu.vector_store %arg13[%c0_83, %c0_84], %82 {strides = array<i32>} : memref<8x384xf32, #tpu.memory_space<vmem>>, vector<8x384xf32>,
    %c0_85 = arith.constant 0 : index
    %c0_86 = arith.constant 0 : index
    %84 = vector.load %arg13[%c0_85, %c0_86] : memref<8x384xf32, #tpu.memory_space<vmem>>, vector<8x384xf32>
    %c0_87 = arith.constant 0 : index
    %c0_88 = arith.constant 0 : index
    %85 = vector.load %arg6[%c0_87, %c0_88] : memref<8x1xf32, #tpu.memory_space<vmem>>, vector<8x1xf32>
    %86 = vector.broadcast %85 : vector<8x1xf32> to vector<8x384xf32>
    %87 = arith.addf %84, %86 : vector<8x384xf32>
    %cst_89 = arith.constant 0.000000e+00 : f32
    %88 = vector.broadcast %cst_89 : f32 to vector<8x384xf32>
    %89 = arith.maximumf %87, %88 : vector<8x384xf32>
    %90 = arith.truncf %89 : vector<8x384xf32> to vector<8x384xbf16>
    %c0_90 = arith.constant 0 : index
    %c0_91 = arith.constant 0 : index
    %91 = vector.load %arg7[%c0_90, %c0_91] : memref<16x8xbf16, #tpu.memory_space<vmem>>, vector<16x8xbf16>
    %cst_92 = arith.constant dense<0.000000e+00> : vector<16x384xf32>
    %92 = tpu.matmul %91, %90, %cst_92 {dimension_numbers = #tpu.dot_dimension_numbers<[1], [0], [0], [1], [0, 0, 1, 1], [], []>} : vector<16x8xbf16>, vector<8x384xbf16>, vector<16x384xf32> -> vector<16x384xf32>
    %c0_93 = arith.constant 0 : index
    %c0_94 = arith.constant 0 : index
    %93 = vector.load %arg8[%c0_93, %c0_94] : memref<16x1xf32, #tpu.memory_space<vmem>>, vector<16x1xf32>
    %94 = vector.broadcast %93 : vector<16x1xf32> to vector<16x384xf32>
    %95 = arith.addf %92, %94 : vector<16x384xf32>
    %cst_95 = arith.constant 0.000000e+00 : f32
    %96 = vector.broadcast %cst_95 : f32 to vector<16x384xf32>
    %97 = arith.maximumf %95, %96 : vector<16x384xf32>
    %c0_96 = arith.constant 0 : index
    %c0_97 = arith.constant 0 : index
    %c19_98 = arith.constant 19 : index
    %98 = vector.load %arg1[%c0_96, %c0_97, %c19_98] : memref<1x4x512xf32, #tpu.memory_space<vmem>>, vector<1x4x384xf32>
    %99 = vector.shape_cast %98 : vector<1x4x384xf32> to vector<4x384xf32>
    %100 = arith.truncf %99 : vector<4x384xf32> to vector<4x384xbf16>
    %c0_99 = arith.constant 0 : index
    %c0_100 = arith.constant 0 : index
    %101 = vector.load %arg9[%c0_99, %c0_100] : memref<16x4xbf16, #tpu.memory_space<vmem>>, vector<16x4xbf16>
    %cst_101 = arith.constant dense<0.000000e+00> : vector<16x384xf32>
    %102 = tpu.matmul %101, %100, %cst_101 {dimension_numbers = #tpu.dot_dimension_numbers<[1], [0], [0], [1], [0, 0, 1, 1], [], []>} : vector<16x4xbf16>, vector<4x384xbf16>, vector<16x384xf32> -> vector<16x384xf32>
    %c0_102 = arith.constant 0 : index
    %c0_103 = arith.constant 0 : index
    %103 = vector.load %arg10[%c0_102, %c0_103] : memref<16x1xf32, #tpu.memory_space<vmem>>, vector<16x1xf32>
    %104 = vector.broadcast %103 : vector<16x1xf32> to vector<16x384xf32>
    %105 = arith.addf %102, %104 : vector<16x384xf32>
    %cst_104 = arith.constant 0.000000e+00 : f32
    %106 = vector.broadcast %cst_104 : f32 to vector<16x384xf32>
    %107 = arith.maximumf %105, %106 : vector<16x384xf32>
    %108 = arith.addf %97, %107 : vector<16x384xf32>
    %c0_105 = arith.constant 0 : index
    %c0_106 = arith.constant 0 : index
    %c0_107 = arith.constant 0 : index
    %109 = vector.load %arg11[%c0_105, %c0_106, %c0_107] : memref<1x16x384xf32, #tpu.memory_space<vmem>>, vector<1x16x384xf32>
    %110 = vector.shape_cast %109 : vector<1x16x384xf32> to vector<16x384xf32>
    %111 = vector.shape_cast %108 : vector<16x384xf32> to vector<1x16x384xf32>
    tpu.vector_store %arg11[%c0_105, %c0_106, %c0_107], %111 {strides = array<i32>} : memref<1x16x384xf32, #tpu.memory_space<vmem>>, vector<1x16x384xf32>,
    return
  }
  func.func @transform_0(%arg0: i32) -> (i32, i32, i32) {
    %c0_i32 = arith.constant 0 : i32
    %c0_i32_0 = arith.constant 0 : i32
    %c0_i32_1 = arith.constant 0 : i32
    return %arg0, %c0_i32, %c0_i32_0 : i32, i32, i32
  }
  func.func @transform_1(%arg0: i32) -> (i32, i32) {
    %c0_i32 = arith.constant 0 : i32
    %c0_i32_0 = arith.constant 0 : i32
    %c0_i32_1 = arith.constant 0 : i32
    return %c0_i32, %c0_i32_0 : i32, i32
  }
  func.func @transform_2(%arg0: i32) -> (i32, i32) {
    %c0_i32 = arith.constant 0 : i32
    %c0_i32_0 = arith.constant 0 : i32
    %c0_i32_1 = arith.constant 0 : i32
    return %c0_i32, %c0_i32_0 : i32, i32
  }
  func.func @transform_3(%arg0: i32) -> (i32, i32) {
    %c0_i32 = arith.constant 0 : i32
    %c0_i32_0 = arith.constant 0 : i32
    %c0_i32_1 = arith.constant 0 : i32
    return %c0_i32, %c0_i32_0 : i32, i32
  }
  func.func @transform_4(%arg0: i32) -> (i32, i32, i32) {
    %c0_i32 = arith.constant 0 : i32
    %c0_i32_0 = arith.constant 0 : i32
    %c0_i32_1 = arith.constant 0 : i32
    %c0_i32_2 = arith.constant 0 : i32
    return %c0_i32, %c0_i32_0, %c0_i32_1 : i32, i32, i32
  }
  func.func @transform_5(%arg0: i32) -> (i32, i32) {
    %c0_i32 = arith.constant 0 : i32
    %c0_i32_0 = arith.constant 0 : i32
    %c0_i32_1 = arith.constant 0 : i32
    return %c0_i32, %c0_i32_0 : i32, i32
  }
  func.func @transform_6(%arg0: i32) -> (i32, i32) {
    %c0_i32 = arith.constant 0 : i32
    %c0_i32_0 = arith.constant 0 : i32
    %c0_i32_1 = arith.constant 0 : i32
    return %c0_i32, %c0_i32_0 : i32, i32
  }
  func.func @transform_7(%arg0: i32) -> (i32, i32) {
    %c0_i32 = arith.constant 0 : i32
    %c0_i32_0 = arith.constant 0 : i32
    %c0_i32_1 = arith.constant 0 : i32
    return %c0_i32, %c0_i32_0 : i32, i32
  }
  func.func @transform_8(%arg0: i32) -> (i32, i32) {
    %c0_i32 = arith.constant 0 : i32
    %c0_i32_0 = arith.constant 0 : i32
    %c0_i32_1 = arith.constant 0 : i32
    return %c0_i32, %c0_i32_0 : i32, i32
  }
  func.func @transform_9(%arg0: i32) -> (i32, i32) {
    %c0_i32 = arith.constant 0 : i32
    %c0_i32_0 = arith.constant 0 : i32
    %c0_i32_1 = arith.constant 0 : i32
    return %c0_i32, %c0_i32_0 : i32, i32
  }
  func.func @transform_10(%arg0: i32) -> (i32, i32, i32) {
    %c0_i32 = arith.constant 0 : i32
    %c0_i32_0 = arith.constant 0 : i32
    %c0_i32_1 = arith.constant 0 : i32
    return %arg0, %c0_i32, %c0_i32_0 : i32, i32, i32
  }
}

</mosaic_0001>

<bundles_post_ra>
// kernel: residual_block_forward.1
= control target key start
LH: loop header
LB: loop body
LE: loop exit
PB: predicated region body
PF: predicated region fallthrough
CT: control target
= control target key end

     0   :  { %s2242_s13 = smov 0   ;;  %s2459_s0 = inlined_call_operand.vmem [shape: f32[2,4,512], index: 0, kind: input, shape index: {}]   ;;  %s2460_s1 = inlined_call_operand.vmem [shape: f32[1,512], index: 1, kind: input, shape index: {}]   ;;  %s2461_s2 = inlined_call_operand.vmem [shape: bf16[8,4], index: 2, kind: input, shape index: {}]   ;;  %s2462_s3 = inlined_call_operand.vmem [shape: f32[8,1], index: 3, kind: input, shape index: {}]   ;;  %s2463_s4 = inlined_call_operand.vmem [shape: bf16[9,8,8], index: 4, kind: input, shape index: {}]   ;;  %s2464_s5 = inlined_call_operand.vmem [shape: f32[8,1], index: 5, kind: input, shape index: {}]   ;;  %s2465_s6 = inlined_call_operand.vmem [shape: bf16[16,8], index: 6, kind: input, shape index: {}]   ;;  %s2466_s7 = inlined_call_operand.vmem [shape: f32[16,1], index: 7, kind: input, shape index: {}]   ;;  %s2467_s8 = inlined_call_operand.vmem [shape: bf16[16,4], index: 8, kind: input, shape index: {}]   ;;  %s2468_s9 = inlined_call_operand.vmem [shape: f32[16,1], index: 9, kind: input, shape index: {}]   ;;  %s2469_s10 = inlined_call_operand.vmem [shape: f32[2,16,384], index: 10, kind: output, shape index: {}]  }
   0x1 LB: > { %s1996_s14 = sadd.s32 4294967295, %s2174_s13   ;;  %p2000_p0 = scmp.ge.s32.totalorder %s2174_s13, 1  ;;  %s2174_s13 = sphi %s2242_s13, %s20_s13  }
   0x2   : > { %p312_p1 = scmp.lt.s32.totalorder %s2174_s13, 3 }
   0x4   : > { %p313_p2 = pnand %p2000_p0, %p312_p1 }
   0x5   : > { %p350_p3 = scmp.lt.s32.totalorder (!%p313_p2), %s1996_s14, 1  ;;  %v2176_v0 = vmov (!%p313_p2), 0   ;;  %v375_v1 = vld [vmem:[%s2462_s3] sm:$0xff] (!%p313_p2)  ;;  %vm385_vm0 = vcmask (!%p313_p2), 1041408   ;;  %vm381_vm1 = vcmask (!%p313_p2), 31744   ;;  %v2177_v13 = vmov (!%p313_p2), 0.0  }
   0x6   : > { %316 = sbr.rel (%p313_p2) target bundleno = 880 (0x370), region = 60  ;;  %430 = vmatprep.mubr.bf16.mxu0 (!%p313_p2), %v2176_v0  ;;  %471 = vmatprep.mubr.bf16.mxu1 (!%p313_p2), %v2176_v0  ;;  %v364_v12 = vld [vmem:[%s2461_s2] sm:$0xf] (!%p313_p2)  ;;  %vm2178_vm2 = vmmov (!%p313_p2), 0   ;;  %v485_v14 = vlaneseq (!%p313_p2)  ;;  %vm524_vm3 = vcmask (!%p313_p2), 1043456   ;;  %s2179_s25 = smov (!%p313_p2), 127  }
   0x7   : > { %2162 = vset.pattern.permute.xlu0 (!%p313_p2), %v2176_v0  ;;  %2163 = vset.pattern.permute.xlu1 (!%p313_p2), %v2176_v0  ;;  %v363_v19 = vld [vmem:[%s2460_s1] sm:$0xf] (!%p313_p2)  ;;  %vm520_vm4 = vcmask (!%p313_p2), 64512   ;;  %s2180_s28 = smov (!%p313_p2), 126   ;;  %s2181_s29 = smov (!%p313_p2), 110   ;;  %v1663_v56 = vld [vmem:[%s2466_s7 + $0x8] sm:$0xff] (!%p313_p2) }
   0x8   : > { %378 = vperm.xlu0 (!%p313_p2), %2162, %v375_v1   ;;  %v486_v15 = vshrl.u32 (!%p313_p2), %v485_v14, 7  ;;  %v519_v52 = vld [vmem:[%s2463_s4] sm:$0xf] (!%p313_p2)  ;;  %s2182_s30 = smov (!%p313_p2), 109   ;;  %s2183_s11 = smov (!%p313_p2), 108   ;;  %v1796_v57 = vld [vmem:[%s2468_s9 + $0x8] sm:$0xff] (!%p313_p2) }
   0x9   : > { %s2184_s12 = smov (!%p313_p2), 92   ;;  %s2185_s15 = smov (!%p313_p2), 91   ;;  %v1662_v53 = vld [vmem:[%s2466_s7] sm:$0xff] (!%p313_p2)  ;;  %vm640_vm5 = vcmask (!%p313_p2), 1039360   ;;  %vm768_vm6 = vcmask (!%p313_p2), 1031168   ;;  %vm896_vm7 = vcmask (!%p313_p2), 900096  }
   0xa   : > { %v487_v16 = vsub.s32 (!%p313_p2), 0, %v486_v15  ;;  %v495_v17 = vsub.s32 (!%p313_p2), 2, %v486_v15  ;;  %v491_v20 = vsub.s32 (!%p313_p2), 1, %v486_v15  ;;  %v499_v21 = vsub.s32 (!%p313_p2), 3, %v486_v15  ;;  %s2186_s16 = smov (!%p313_p2), 90   ;;  %v1795_v54 = vld [vmem:[%s2468_s9] sm:$0xff] (!%p313_p2) }
   0xb   : > { %v1645_v55 = vld [vmem:[%s2464_s5] sm:$0xff] (!%p313_p2)  ;;  %v2015_v15 = vld [vmem:[%s2463_s4 + $0x8] sm:$0xf] (!%p313_p2)  ;;  %vm1024_vm8 = vcmask (!%p313_p2), 891904   ;;  %vm1152_vm9 = vcmask (!%p313_p2), 883712   ;;  %vm1280_vm10 = vcmask (!%p313_p2), 752640  }
   0xc   : > { %v488_v25 = vrot.slane (!%p313_p2), %v363_v19, %v487_v16  ;;  %v496_v27 = vrot.slane (!%p313_p2), %v363_v19, %v495_v17  ;;  %v492_v31 = vrot.slane (!%p313_p2), %v363_v19, %v491_v20  ;;  %v500_v37 = vrot.slane (!%p313_p2), %v363_v19, %v499_v21 }
   0xd   : > { %s2471_s14 = smov (!%p350_p3, %s1996_s14), 1  ;;  %vm1408_vm11 = vcmask 744448   ;;  %vm1536_vm12 = vcmask 736256  }
   0xe   : > { %s2053_s17 = sshll.u32 %s2471_s14, 4 }
   0xf   : > { %s354_s20 = scalar_lea.vmem %s2459_s0, %s2053_s17 }
  0x10   : > { %v361_v2 = vld [vmem:[%s354_s20] sm:$0xff]  ;;  %v362_v3 = vld [vmem:[%s354_s20 + $0x8] sm:$0xff] }
  0x11   : > { %v367_v4 = vcombine.high %v361_v2, %v361_v2  ;;  %v368_v5 = vcombine.high %v362_v3, %v362_v3  ;;  %v2263_v6 = vpack.c.bf16 %v361_v2, %v361_v2  ;;  %v2265_v7 = vpack.c.bf16 %v362_v3, %v362_v3 }
  0x13   : > { %v2267_v8 = vpack.c.bf16 %v367_v4, %v367_v4  ;;  %v2269_v9 = vpack.c.bf16 %v368_v5, %v368_v5  ;;  %v387_v10 = vsel %vm385_vm0, %v2263_v6, 0  ;;  %v393_v11 = vsel %vm385_vm0, %v2265_v7, 0  ;;  %v2011_v4 = vld [vmem:[%s2463_s4 + $0x4] sm:$0xf] }
  0x15   : > { %2004 = vmatprep.subr.msk.bf16.mxu0 %vm385_vm0, %v2267_v8  ;;  %2006 = vmatprep.subr.msk.bf16.mxu1 %vm385_vm0, %v2269_v9 }
  0x16   : > { %399 = vmatpush1.bf16.msra.mxu0 %v387_v10  ;;  %440 = vmatpush1.bf16.msra.mxu1 %v393_v11 }
  0x17   : > { %2076 = vmatprep.subr.bf16.mxu1 %v2177_v13 }
  0x19   : > { %2005 = vmatmul.mubr.msk.bf16.vlgmr.msra.gmra.mrb[0].mxu0 %vm381_vm1, %v364_v12  ;;  %2007 = vmatmul.mubr.msk.bf16.vlgmr.msra.gmra.mrb[0].mxu1 %vm381_vm1, %v364_v12 }
  0x1a   : > { %566 = vmatprep.mubr.bf16.mxu0 %v2176_v0  ;;  %2078 = vmatprep.mubr.msk.bf16.mxu1 %vm2178_vm2, %v2177_v13 }
  0x87   : > { %v379_v18 = vpop.permute.xlu0 %378 }
  0xec   : > { %v432_v22 = vpop.f32.mrb[0].mxu0  ;;  %v473_v23 = vpop.f32.mrb[0].mxu1 }
  0xed   : > { %v433_v24 = vadd.f32 %v432_v22, %v379_v18  ;;  %v474_v26 = vadd.f32 %v473_v23, %v379_v18  ;;  %v434_v28 = vpop.f32.mrb[1].mxu0  ;;  %v475_v29 = vpop.f32.mrb[1].mxu1 }
  0xee   : > { %v435_v30 = vadd.f32 %v434_v28, %v379_v18  ;;  %v476_v32 = vadd.f32 %v475_v29, %v379_v18  ;;  %v436_v33 = vpop.f32.mrb[2].mxu0  ;;  %v477_v34 = vpop.f32.mrb[2].mxu1 }
  0xef   : > { %v480_v35 = vmax.f32 %v433_v24, 0.0  ;;  %v482_v36 = vmax.f32 %v474_v26, 0.0  ;;  %v437_v38 = vpop.f32.mrb[3].mxu0  ;;  %v478_v39 = vpop.f32.mrb[3].mxu1 }
  0xf0   : > { %v481_v40 = vmax.f32 %v435_v30, 0.0  ;;  %v483_v41 = vmax.f32 %v476_v32, 0.0 }
  0xf1   : > { %v505_v42 = vmul.f32 %v488_v25, %v480_v35  ;;  %v507_v43 = vmul.f32 %v496_v27, %v482_v36  ;;  %v2019_v25 = vld [vmem:[%s2463_s4 + $0xc] sm:$0xf]  ;;  %v2023_v35 = vld [vmem:[%s2463_s4 + $0x10] sm:$0xf] }
  0xf2   : > { %v506_v44 = vmul.f32 %v492_v31, %v481_v40  ;;  %v508_v47 = vmul.f32 %v500_v37, %v483_v41 }
  0xf3   : > { %v516_v45 = vpack.c.bf16 %v505_v42, %v505_v42  ;;  %v518_v46 = vpack.c.bf16 %v507_v43, %v507_v43 }
  0xf4   : > { %v517_v48 = vpack.c.bf16 %v506_v44, %v506_v44  ;;  %v625_v51 = vpack.c.bf16 %v508_v47, %v508_v47 }
  0xf5   : > { %636 = vrot.lane.b32.xlu1 %v518_v46, %s2179_s25  ;;  %632 = vrot.lane.b32.xlu0 %v516_v45, %s2179_s25  ;;  %v532_v49 = vsel %vm524_vm3, %v518_v46, 0  ;;  %v526_v50 = vsel %vm524_vm3, %v516_v45, 0 }
  0xf6   : > { %2008 = vmatprep.subr.msk.bf16.mxu0 %vm524_vm3, %v517_v48  ;;  %2077 = vmatpush3.bf16.msra.mxu1 %v532_v49 }
  0xf7   : > { %535 = vmatpush1.bf16.msra.mxu0 %v526_v50  ;;  %2082 = vmatprep.subr.bf16.mxu1 %v2177_v13 }
  0xf9   : > { %634 = vrot.lane.b32.xlu1 %v517_v48, %s2179_s25  ;;  %638 = vrot.lane.b32.xlu0 %v625_v51, %s2179_s25 }
  0xfa   : > { %2009 = vmatmul.mubr.msk.bf16.vlgmr.msra.gmra.mrb[4].mxu0 %vm520_vm4, %v519_v52  ;;  %2079 = vmatmul.mubr.msk.bf16.vlgmr.msra.gmra.mrb[4].mxu1 %vm520_vm4, %v519_v52 }
  0xfb   : > { %688 = vmatprep.mubr.bf16.mxu0 %v2176_v0  ;;  %2084 = vmatprep.mubr.msk.bf16.mxu1 %vm2178_vm2, %v2177_v13 }
  0xfd   : > { %760 = vrot.lane.b32.xlu1 %v516_v45, %s2180_s28  ;;  %762 = vrot.lane.b32.xlu0 %v517_v48, %s2180_s28 }
 0x101   : > { %764 = vrot.lane.b32.xlu1 %v518_v46, %s2180_s28  ;;  %766 = vrot.lane.b32.xlu0 %v625_v51, %s2180_s28 }
 0x105   : > { %888 = vrot.lane.b32.xlu1 %v516_v45, %s2181_s29  ;;  %890 = vrot.lane.b32.xlu0 %v517_v48, %s2181_s29 }
 0x109   : > { %892 = vrot.lane.b32.xlu1 %v518_v46, %s2181_s29  ;;  %894 = vrot.lane.b32.xlu0 %v625_v51, %s2181_s29  ;;  %s2142_s29 = smul.u32 48, %s2471_s14 }
 0x10d   : > { %1016 = vrot.lane.b32.xlu1 %v516_v45, %s2182_s30  ;;  %1018 = vrot.lane.b32.xlu0 %v517_v48, %s2182_s30 }
 0x111   : > { %1020 = vrot.lane.b32.xlu1 %v518_v46, %s2182_s30  ;;  %1022 = vrot.lane.b32.xlu0 %v625_v51, %s2182_s30 }
 0x115   : > { %1144 = vrot.lane.b32.xlu1 %v516_v45, %s2183_s11  ;;  %1146 = vrot.lane.b32.xlu0 %v517_v48, %s2183_s11 }
 0x119   : > { %1148 = vrot.lane.b32.xlu1 %v518_v46, %s2183_s11  ;;  %1150 = vrot.lane.b32.xlu0 %v625_v51, %s2183_s11  ;;  %s359_s11 = scalar_lea.vmem %s2469_s10, %s2142_s29 }
 0x11d   : > { %1272 = vrot.lane.b32.xlu1 %v516_v45, %s2184_s12  ;;  %1274 = vrot.lane.b32.xlu0 %v517_v48, %s2184_s12 }
 0x121   : > { %1276 = vrot.lane.b32.xlu1 %v518_v46, %s2184_s12  ;;  %1278 = vrot.lane.b32.xlu0 %v625_v51, %s2184_s12 }
 0x125   : > { %1400 = vrot.lane.b32.xlu1 %v516_v45, %s2185_s15  ;;  %1402 = vrot.lane.b32.xlu0 %v517_v48, %s2185_s15 }
 0x129   : > { %1404 = vrot.lane.b32.xlu1 %v518_v46, %s2185_s15  ;;  %1406 = vrot.lane.b32.xlu0 %v625_v51, %s2185_s15 }
 0x12d   : > { %1528 = vrot.lane.b32.xlu1 %v516_v45, %s2186_s16  ;;  %1530 = vrot.lane.b32.xlu0 %v517_v48, %s2186_s16  ;;  %v2027_v45 = vld [vmem:[%s2463_s4 + $0x14] sm:$0xf] }
 0x131   : > { %1532 = vrot.lane.b32.xlu1 %v518_v46, %s2186_s16  ;;  %1534 = vrot.lane.b32.xlu0 %v625_v51, %s2186_s16 }
 0x135   : > { %1816 = vrot.lane.b32.xlu0 %v2263_v6, %s2182_s30  ;;  %1648 = vperm.xlu1 %2163, %v1645_v55   ;;  %v2031_v55 = vld [vmem:[%s2463_s4 + $0x18] sm:$0xf] }
 0x139   : > { %1820 = vrot.lane.b32.xlu0 %v2265_v7, %s2182_s30  ;;  %1818 = vrot.lane.b32.xlu1 %v2267_v8, %s2182_s30 }
 0x13d   : > { %1666 = vperm.xlu0 %2162, %v1662_v53   ;;  %1822 = vrot.lane.b32.xlu1 %v2269_v9, %s2182_s30 }
 0x141   : > { %1799 = vperm.xlu0 %2162, %v1795_v54   ;;  %1671 = vperm.xlu1 %2163, %v1663_v56  }
 0x145   : > { %1804 = vperm.xlu1 %2163, %v1796_v57  }
 0x167   : > { %v637_v58 = vpop.permute.xlu1 %636  ;;  %v633_v59 = vpop.permute.xlu0 %632 }
 0x16b   : > { %v635_v60 = vpop.permute.xlu1 %634  ;;  %v639_v61 = vpop.permute.xlu0 %638 }
 0x16c   : > { %v641_v62 = vsel %vm640_vm5, %v633_v59, %v635_v60  ;;  %v642_v63 = vsel %vm640_vm5, %v635_v60, %v637_v58  ;;  %v643_v1 = vsel %vm640_vm5, %v637_v58, %v639_v61 }
 0x16d   : > { %v648_v2 = vsel %vm524_vm3, %v641_v62, 0  ;;  %v654_v3 = vsel %vm524_vm3, %v643_v1, 0  ;;  %2012 = vmatprep.subr.msk.bf16.mxu0 %vm524_vm3, %v642_v63 }
 0x16e   : > { %657 = vmatpush1.bf16.msra.mxu0 %v648_v2  ;;  %2083 = vmatpush3.bf16.msra.mxu1 %v654_v3  ;;  %v2035_v2 = vld [vmem:[%s2463_s4 + $0x1c] sm:$0xf] }
 0x16f   : > { %v761_v5 = vpop.permute.xlu1 %760  ;;  %v763_v6 = vpop.permute.xlu0 %762  ;;  %2088 = vmatprep.subr.bf16.mxu1 %v2177_v13 }
 0x170   : > { %v769_v7 = vsel %vm768_vm6, %v761_v5, %v763_v6 }
 0x171   : > { %2013 = vmatmul.mubr.msk.bf16.vlgmr.msra.gmra.mrb[8].mxu0 %vm520_vm4, %v2011_v4  ;;  %2085 = vmatmul.mubr.msk.bf16.vlgmr.msra.gmra.mrb[8].mxu1 %vm520_vm4, %v2011_v4  ;;  %v776_v12 = vsel %vm524_vm3, %v769_v7, 0 }
 0x172   : > { %816 = vmatprep.mubr.bf16.mxu0 %v2176_v0  ;;  %2090 = vmatprep.mubr.msk.bf16.mxu1 %vm2178_vm2, %v2177_v13 }
 0x173   : > { %v765_v8 = vpop.permute.xlu1 %764  ;;  %v767_v9 = vpop.permute.xlu0 %766 }
 0x174   : > { %v770_v10 = vsel %vm768_vm6, %v763_v6, %v765_v8  ;;  %v771_v11 = vsel %vm768_vm6, %v765_v8, %v767_v9 }
 0x175   : > { %v782_v14 = vsel %vm524_vm3, %v771_v11, 0  ;;  %2016 = vmatprep.subr.msk.bf16.mxu0 %vm524_vm3, %v770_v10 }
 0x176   : > { %785 = vmatpush1.bf16.msra.mxu0 %v776_v12  ;;  %2089 = vmatpush3.bf16.msra.mxu1 %v782_v14  ;;  %v2039_v12 = vld [vmem:[%s2463_s4 + $0x20] sm:$0xf] }
 0x177   : > { %v889_v16 = vpop.permute.xlu1 %888  ;;  %v891_v17 = vpop.permute.xlu0 %890  ;;  %2094 = vmatprep.subr.bf16.mxu1 %v2177_v13 }
 0x178   : > { %v897_v18 = vsel %vm896_vm7, %v889_v16, %v891_v17 }
 0x179   : > { %2017 = vmatmul.mubr.msk.bf16.vlgmr.msra.gmra.mrb[12].mxu0 %vm520_vm4, %v2015_v15  ;;  %2091 = vmatmul.mubr.msk.bf16.vlgmr.msra.gmra.mrb[12].mxu1 %vm520_vm4, %v2015_v15  ;;  %v904_v23 = vsel %vm524_vm3, %v897_v18, 0 }
 0x17a   : > { %944 = vmatprep.mubr.bf16.mxu0 %v2176_v0  ;;  %2096 = vmatprep.mubr.msk.bf16.mxu1 %vm2178_vm2, %v2177_v13 }
 0x17b   : > { %v893_v19 = vpop.permute.xlu1 %892  ;;  %v895_v20 = vpop.permute.xlu0 %894 }
 0x17c   : > { %v898_v21 = vsel %vm896_vm7, %v891_v17, %v893_v19  ;;  %v899_v22 = vsel %vm896_vm7, %v893_v19, %v895_v20 }
 0x17d   : > { %v910_v24 = vsel %vm524_vm3, %v899_v22, 0  ;;  %2020 = vmatprep.subr.msk.bf16.mxu0 %vm524_vm3, %v898_v21 }
 0x17e   : > { %913 = vmatpush1.bf16.msra.mxu0 %v904_v23  ;;  %2095 = vmatpush3.bf16.msra.mxu1 %v910_v24 }
 0x17f   : > { %v1017_v26 = vpop.permute.xlu1 %1016  ;;  %v1019_v27 = vpop.permute.xlu0 %1018  ;;  %2100 = vmatprep.subr.bf16.mxu1 %v2177_v13 }
 0x180   : > { %v1025_v28 = vsel %vm1024_vm8, %v1017_v26, %v1019_v27 }
 0x181   : > { %2021 = vmatmul.mubr.msk.bf16.vlgmr.msra.gmra.mrb[16].mxu0 %vm520_vm4, %v2019_v25  ;;  %2097 = vmatmul.mubr.msk.bf16.vlgmr.msra.gmra.mrb[16].mxu1 %vm520_vm4, %v2019_v25  ;;  %v1032_v33 = vsel %vm524_vm3, %v1025_v28, 0 }
 0x182   : > { %1072 = vmatprep.mubr.bf16.mxu0 %v2176_v0  ;;  %2102 = vmatprep.mubr.msk.bf16.mxu1 %vm2178_vm2, %v2177_v13 }
 0x183   : > { %v1021_v29 = vpop.permute.xlu1 %1020  ;;  %v1023_v30 = vpop.permute.xlu0 %1022 }
 0x184   : > { %v1026_v31 = vsel %vm1024_vm8, %v1019_v27, %v1021_v29  ;;  %v1027_v32 = vsel %vm1024_vm8, %v1021_v29, %v1023_v30 }
 0x185   : > { %v1038_v34 = vsel %vm524_vm3, %v1027_v32, 0  ;;  %2024 = vmatprep.subr.msk.bf16.mxu0 %vm524_vm3, %v1026_v31 }
 0x186   : > { %1041 = vmatpush1.bf16.msra.mxu0 %v1032_v33  ;;  %2101 = vmatpush3.bf16.msra.mxu1 %v1038_v34 }
 0x187   : > { %v1145_v36 = vpop.permute.xlu1 %1144  ;;  %v1147_v37 = vpop.permute.xlu0 %1146  ;;  %2106 = vmatprep.subr.bf16.mxu1 %v2177_v13 }
 0x188   : > { %v1153_v38 = vsel %vm1152_vm9, %v1145_v36, %v1147_v37 }
 0x189   : > { %2025 = vmatmul.mubr.msk.bf16.vlgmr.msra.gmra.mrb[20].mxu0 %vm520_vm4, %v2023_v35  ;;  %2103 = vmatmul.mubr.msk.bf16.vlgmr.msra.gmra.mrb[20].mxu1 %vm520_vm4, %v2023_v35  ;;  %v1160_v43 = vsel %vm524_vm3, %v1153_v38, 0 }
 0x18a   : > { %1200 = vmatprep.mubr.bf16.mxu0 %v2176_v0  ;;  %2108 = vmatprep.mubr.msk.bf16.mxu1 %vm2178_vm2, %v2177_v13 }
 0x18b   : > { %v1149_v39 = vpop.permute.xlu1 %1148  ;;  %v1151_v40 = vpop.permute.xlu0 %1150 }
 0x18c   : > { %v1154_v41 = vsel %vm1152_vm9, %v1147_v37, %v1149_v39  ;;  %v1155_v42 = vsel %vm1152_vm9, %v1149_v39, %v1151_v40 }
 0x18d   : > { %v1166_v44 = vsel %vm524_vm3, %v1155_v42, 0  ;;  %2028 = vmatprep.subr.msk.bf16.mxu0 %vm524_vm3, %v1154_v41 }
 0x18e   : > { %1169 = vmatpush1.bf16.msra.mxu0 %v1160_v43  ;;  %2107 = vmatpush3.bf16.msra.mxu1 %v1166_v44 }
 0x18f   : > { %v1273_v46 = vpop.permute.xlu1 %1272  ;;  %v1275_v47 = vpop.permute.xlu0 %1274  ;;  %2112 = vmatprep.subr.bf16.mxu1 %v2177_v13 }
 0x190   : > { %v1281_v48 = vsel %vm1280_vm10, %v1273_v46, %v1275_v47 }
 0x191   : > { %2029 = vmatmul.mubr.msk.bf16.vlgmr.msra.gmra.mrb[24].mxu0 %vm520_vm4, %v2027_v45  ;;  %2109 = vmatmul.mubr.msk.bf16.vlgmr.msra.gmra.mrb[24].mxu1 %vm520_vm4, %v2027_v45  ;;  %v1288_v53 = vsel %vm524_vm3, %v1281_v48, 0 }
 0x192   : > { %1328 = vmatprep.mubr.bf16.mxu0 %v2176_v0  ;;  %2114 = vmatprep.mubr.msk.bf16.mxu1 %vm2178_vm2, %v2177_v13 }
 0x193   : > { %v1277_v49 = vpop.permute.xlu1 %1276  ;;  %v1279_v50 = vpop.permute.xlu0 %1278 }
 0x194   : > { %v1282_v51 = vsel %vm1280_vm10, %v1275_v47, %v1277_v49  ;;  %v1283_v52 = vsel %vm1280_vm10, %v1277_v49, %v1279_v50 }
 0x195   : > { %v1294_v54 = vsel %vm524_vm3, %v1283_v52, 0  ;;  %2032 = vmatprep.subr.msk.bf16.mxu0 %vm524_vm3, %v1282_v51 }
 0x196   : > { %1297 = vmatpush1.bf16.msra.mxu0 %v1288_v53  ;;  %2113 = vmatpush3.bf16.msra.mxu1 %v1294_v54 }
 0x197   : > { %v1401_v56 = vpop.permute.xlu1 %1400  ;;  %v1403_v57 = vpop.permute.xlu0 %1402  ;;  %2118 = vmatprep.subr.bf16.mxu1 %v2177_v13 }
 0x198   : > { %v1409_v58 = vsel %vm1408_vm11, %v1401_v56, %v1403_v57 }
 0x199   : > { %2033 = vmatmul.mubr.msk.bf16.vlgmr.msra.gmra.mrb[28].mxu0 %vm520_vm4, %v2031_v55  ;;  %2115 = vmatmul.mubr.msk.bf16.vlgmr.msra.gmra.mrb[28].mxu1 %vm520_vm4, %v2031_v55  ;;  %v1416_v63 = vsel %vm524_vm3, %v1409_v58, 0 }
 0x19a   : > { %1456 = vmatprep.mubr.bf16.mxu0 %v2176_v0  ;;  %2120 = vmatprep.mubr.msk.bf16.mxu1 %vm2178_vm2, %v2177_v13 }
 0x19b   : > { %v1405_v59 = vpop.permute.xlu1 %1404  ;;  %v1407_v60 = vpop.permute.xlu0 %1406 }
 0x19c   : > { %v1410_v61 = vsel %vm1408_vm11, %v1403_v57, %v1405_v59  ;;  %v1411_v62 = vsel %vm1408_vm11, %v1405_v59, %v1407_v60 }
 0x19d   : > { %v1422_v1 = vsel %vm524_vm3, %v1411_v62, 0  ;;  %2036 = vmatprep.subr.msk.bf16.mxu0 %vm524_vm3, %v1410_v61 }
 0x19e   : > { %1425 = vmatpush1.bf16.msra.mxu0 %v1416_v63  ;;  %2119 = vmatpush3.bf16.msra.mxu1 %v1422_v1 }
 0x19f   : > { %v1529_v3 = vpop.permute.xlu1 %1528  ;;  %v1531_v4 = vpop.permute.xlu0 %1530  ;;  %2124 = vmatprep.subr.bf16.mxu1 %v2177_v13 }
 0x1a0   : > { %v1537_v5 = vsel %vm1536_vm12, %v1529_v3, %v1531_v4 }
 0x1a1   : > { %2037 = vmatmul.mubr.msk.bf16.vlgmr.msra.gmra.mrb[32].mxu0 %vm520_vm4, %v2035_v2  ;;  %2121 = vmatmul.mubr.msk.bf16.vlgmr.msra.gmra.mrb[32].mxu1 %vm520_vm4, %v2035_v2  ;;  %v1544_v10 = vsel %vm524_vm3, %v1537_v5, 0 }
 0x1a2   : > { %1584 = vmatprep.mubr.bf16.mxu0 %v2176_v0  ;;  %2126 = vmatprep.mubr.msk.bf16.mxu1 %vm2178_vm2, %v2177_v13 }
 0x1a3   : > { %v1533_v6 = vpop.permute.xlu1 %1532  ;;  %v1535_v7 = vpop.permute.xlu0 %1534 }
 0x1a4   : > { %v1538_v8 = vsel %vm1536_vm12, %v1531_v4, %v1533_v6  ;;  %v1539_v9 = vsel %vm1536_vm12, %v1533_v6, %v1535_v7 }
 0x1a5   : > { %v1550_v11 = vsel %vm524_vm3, %v1539_v9, 0  ;;  %2040 = vmatprep.subr.msk.bf16.mxu0 %vm524_vm3, %v1538_v8 }
 0x1a6   : > { %1553 = vmatpush1.bf16.msra.mxu0 %v1544_v10  ;;  %2125 = vmatpush3.bf16.msra.mxu1 %v1550_v11 }
 0x1a7   : > { %2130 = vmatprep.subr.bf16.mxu1 %v2177_v13 }
 0x1a9   : > { %2041 = vmatmul.mubr.msk.bf16.vlgmr.msra.gmra.mrb[36].mxu0 %vm520_vm4, %v2039_v12  ;;  %2127 = vmatmul.mubr.msk.bf16.vlgmr.msra.gmra.mrb[36].mxu1 %vm520_vm4, %v2039_v12 }
 0x1aa   : > { %2132 = vmatprep.mubr.msk.bf16.mxu1 %vm2178_vm2, %v2177_v13  ;;  %1723 = vmatprep.mubr.bf16.mxu0 %v2176_v0 }
 0x1cd   : > { %v568_v14 = vpop.f32.mrb[4].mxu0  ;;  %v609_v15 = vpop.f32.mrb[4].mxu1 }
 0x1ce   : > { %v570_v16 = vpop.f32.mrb[5].mxu0  ;;  %v2080_v17 = vpop.f32.mrb[5].mxu1 }
 0x1cf   : > { %v572_v18 = vpop.f32.mrb[6].mxu0  ;;  %v612_v19 = vpop.f32.mrb[6].mxu1 }
 0x1d0   : > { %v573_v20 = vpop.f32.mrb[7].mxu0  ;;  %v2081_v21 = vpop.f32.mrb[7].mxu1 }
 0x244   : > { %v690_v22 = vpop.f32.mrb[8].mxu0  ;;  %v731_v23 = vpop.f32.mrb[8].mxu1 }
 0x245   : > { %v740_v24 = vadd.f32 %v690_v22, %v568_v14  ;;  %v742_v25 = vadd.f32 %v731_v23, %v609_v15  ;;  %v692_v26 = vpop.f32.mrb[9].mxu0  ;;  %v2086_v27 = vpop.f32.mrb[9].mxu1 }
 0x246   : > { %v741_v28 = vadd.f32 %v692_v26, %v570_v16  ;;  %v694_v29 = vpop.f32.mrb[10].mxu0  ;;  %v734_v30 = vpop.f32.mrb[10].mxu1 }
 0x247   : > { %v695_v31 = vpop.f32.mrb[11].mxu0  ;;  %v2087_v32 = vpop.f32.mrb[11].mxu1 }
 0x248   : > { %v1649_v26 = vpop.permute.xlu1 %1648 }
 0x24c   : > { %v818_v33 = vpop.f32.mrb[12].mxu0  ;;  %v859_v34 = vpop.f32.mrb[12].mxu1 }
 0x24d   : > { %v868_v35 = vadd.f32 %v818_v33, %v740_v24  ;;  %v870_v36 = vadd.f32 %v859_v34, %v742_v25  ;;  %v820_v37 = vpop.f32.mrb[13].mxu0  ;;  %v2092_v38 = vpop.f32.mrb[13].mxu1 }
 0x24e   : > { %v869_v39 = vadd.f32 %v820_v37, %v741_v28  ;;  %v822_v40 = vpop.f32.mrb[14].mxu0  ;;  %v862_v41 = vpop.f32.mrb[14].mxu1 }
 0x24f   : > { %v823_v42 = vpop.f32.mrb[15].mxu0  ;;  %v2093_v43 = vpop.f32.mrb[15].mxu1 }
 0x250   : > { %v1817_v38 = vpop.permute.xlu0 %1816 }
 0x254   : > { %v946_v44 = vpop.f32.mrb[16].mxu0  ;;  %v987_v45 = vpop.f32.mrb[16].mxu1 }
 0x255   : > { %v996_v46 = vadd.f32 %v946_v44, %v868_v35  ;;  %v998_v47 = vadd.f32 %v987_v45, %v870_v36  ;;  %v948_v48 = vpop.f32.mrb[17].mxu0  ;;  %v2098_v49 = vpop.f32.mrb[17].mxu1 }
 0x256   : > { %v997_v50 = vadd.f32 %v948_v48, %v869_v39  ;;  %v950_v51 = vpop.f32.mrb[18].mxu0  ;;  %v990_v52 = vpop.f32.mrb[18].mxu1 }
 0x257   : > { %v951_v53 = vpop.f32.mrb[19].mxu0  ;;  %v2099_v54 = vpop.f32.mrb[19].mxu1 }
 0x258   : > { %v1819_v39 = vpop.permute.xlu1 %1818 }
 0x25c   : > { %v1074_v55 = vpop.f32.mrb[20].mxu0  ;;  %v1115_v56 = vpop.f32.mrb[20].mxu1 }
 0x25d   : > { %v1124_v57 = vadd.f32 %v1074_v55, %v996_v46  ;;  %v1126_v58 = vadd.f32 %v1115_v56, %v998_v47  ;;  %v1076_v59 = vpop.f32.mrb[21].mxu0  ;;  %v2104_v60 = vpop.f32.mrb[21].mxu1 }
 0x25e   : > { %v1125_v61 = vadd.f32 %v1076_v59, %v997_v50  ;;  %v1078_v62 = vpop.f32.mrb[22].mxu0  ;;  %v1118_v63 = vpop.f32.mrb[22].mxu1 }
 0x25f   : > { %v1079_v1 = vpop.f32.mrb[23].mxu0  ;;  %v2105_v2 = vpop.f32.mrb[23].mxu1  ;;  %v1824_v63 = vsel %vm1024_vm8, %v1817_v38, %v1819_v39 }
 0x264   : > { %v1202_v3 = vpop.f32.mrb[24].mxu0  ;;  %v1243_v4 = vpop.f32.mrb[24].mxu1 }
 0x265   : > { %v1252_v5 = vadd.f32 %v1202_v3, %v1124_v57  ;;  %v1254_v6 = vadd.f32 %v1243_v4, %v1126_v58  ;;  %v1204_v7 = vpop.f32.mrb[25].mxu0  ;;  %v2110_v8 = vpop.f32.mrb[25].mxu1  ;;  %v2166_v4 = vld [vmem:[%s2465_s6] sm:$0xff]  }
 0x266   : > { %v1253_v9 = vadd.f32 %v1204_v7, %v1125_v61  ;;  %v1206_v10 = vpop.f32.mrb[26].mxu0  ;;  %v1246_v11 = vpop.f32.mrb[26].mxu1  ;;  %v2167_v7 = vld [vmem:[%s2467_s8] sm:$0xff]  }
 0x267   : > { %v1207_v12 = vpop.f32.mrb[27].mxu0  ;;  %v2111_v14 = vpop.f32.mrb[27].mxu1 }
 0x268   : > { %v1821_v57 = vpop.permute.xlu0 %1820  ;;  %v1823_v58 = vpop.permute.xlu1 %1822 }
 0x269   : > { %v1826_v61 = vsel %vm1024_vm8, %v1821_v57, %v1823_v58  ;;  %v1825_v1 = vsel %vm1024_vm8, %v1819_v39, %v1821_v57 }
 0x26c   : > { %v1330_v15 = vpop.f32.mrb[28].mxu0  ;;  %v1371_v16 = vpop.f32.mrb[28].mxu1 }
 0x26d   : > { %v1380_v17 = vadd.f32 %v1330_v15, %v1252_v5  ;;  %v1382_v18 = vadd.f32 %v1371_v16, %v1254_v6  ;;  %v1332_v19 = vpop.f32.mrb[29].mxu0  ;;  %v2116_v20 = vpop.f32.mrb[29].mxu1  ;;  %v1837_v5 = vsel %vm385_vm0, %v1826_v61, 0  ;;  %v1831_v6 = vsel %vm385_vm0, %v1824_v63, 0 }
 0x26e   : > { %v1381_v21 = vadd.f32 %v1332_v19, %v1253_v9  ;;  %v1334_v22 = vpop.f32.mrb[30].mxu0  ;;  %v1374_v23 = vpop.f32.mrb[30].mxu1 }
 0x26f   : > { %v1335_v24 = vpop.f32.mrb[31].mxu0  ;;  %v2117_v25 = vpop.f32.mrb[31].mxu1 }
 0x270   : > { %v1667_v8 = vpop.permute.xlu0 %1666  ;;  %v1672_v9 = vpop.permute.xlu1 %1671 }
 0x274   : > { %v1458_v27 = vpop.f32.mrb[32].mxu0  ;;  %v1499_v28 = vpop.f32.mrb[32].mxu1 }
 0x275   : > { %v1508_v29 = vadd.f32 %v1458_v27, %v1380_v17  ;;  %v1510_v30 = vadd.f32 %v1499_v28, %v1382_v18  ;;  %v1460_v31 = vpop.f32.mrb[33].mxu0  ;;  %v2122_v32 = vpop.f32.mrb[33].mxu1 }
 0x276   : > { %v1509_v33 = vadd.f32 %v1460_v31, %v1381_v21  ;;  %v1462_v34 = vpop.f32.mrb[34].mxu0  ;;  %v1502_v35 = vpop.f32.mrb[34].mxu1 }
 0x277   : > { %v1463_v36 = vpop.f32.mrb[35].mxu0  ;;  %v2123_v37 = vpop.f32.mrb[35].mxu1 }
 0x278   : > { %v1800_v19 = vpop.permute.xlu0 %1799  ;;  %v1805_v20 = vpop.permute.xlu1 %1804 }
 0x27c   : > { %v1586_v40 = vpop.f32.mrb[36].mxu0  ;;  %v1627_v41 = vpop.f32.mrb[36].mxu1 }
 0x27d   : > { %v1636_v42 = vadd.f32 %v1586_v40, %v1508_v29  ;;  %v1638_v43 = vadd.f32 %v1627_v41, %v1510_v30  ;;  %v1588_v44 = vpop.f32.mrb[37].mxu0  ;;  %v2128_v45 = vpop.f32.mrb[37].mxu1 }
 0x27e   : > { %v1637_v46 = vadd.f32 %v1588_v44, %v1509_v33  ;;  %v1590_v47 = vpop.f32.mrb[38].mxu0  ;;  %v1630_v48 = vpop.f32.mrb[38].mxu1 }
 0x27f   : > { %v1651_v49 = vadd.f32 %v1649_v26, %v1636_v42  ;;  %v1653_v50 = vadd.f32 %v1649_v26, %v1638_v43  ;;  %v1591_v51 = vpop.f32.mrb[39].mxu0  ;;  %v2129_v52 = vpop.f32.mrb[39].mxu1 }
 0x280   : > { %v1652_v53 = vadd.f32 %v1649_v26, %v1637_v46 }
 0x281   : > { %v1654_v54 = vmax.f32 %v1651_v49, 0.0  ;;  %v1656_v55 = vmax.f32 %v1653_v50, 0.0 }
 0x282   : > { %v1655_v56 = vmax.f32 %v1652_v53, 0.0 }
 0x283   : > { %v1657_v59 = vpack.c.bf16 %v1654_v54, %v1654_v54  ;;  %v1659_v60 = vpack.c.bf16 %v1656_v55, %v1656_v55 }
 0x284   : > { %v1658_v62 = vpack.c.bf16 %v1655_v56, %v1655_v56 }
 0x285   : > { %v1689_v2 = vsel %vm524_vm3, %v1659_v60, 0  ;;  %v1683_v3 = vsel %vm524_vm3, %v1657_v59, 0 }
 0x286   : > { %2044 = vmatprep.subr.msk.bf16.mxu0 %vm524_vm3, %v1658_v62  ;;  %2131 = vmatpush3.bf16.msra.mxu1 %v1689_v2 }
 0x287   : > { %1692 = vmatpush1.bf16.msra.mxu0 %v1683_v3  ;;  %2136 = vmatprep.subr.bf16.mxu1 %v2177_v13 }
 0x288   : > { %2048 = vmatprep.subr.msk.bf16.mxu0 %vm385_vm0, %v1825_v1 }
 0x289   : > { %2133 = vmatmul.mubr.msk.bf16.vlgmr.msra.gmra.mrb[40].mxu1 %vm520_vm4, %v2166_v4 }
 0x28a   : > { %2045 = vmatmul.mubr.msk.bf16.vlgmr.msra.gmra.mrb[40].mxu0 %vm520_vm4, %v2166_v4  ;;  %2137 = vmatpush3.bf16.msra.mxu1 %v1837_v5 }
 0x28b   : > { %1840 = vmatpush1.bf16.msra.mxu0 %v1831_v6  ;;  %2138 = vmatprep.mubr.msk.bf16.mxu1 %vm2178_vm2, %v2177_v13 }
 0x28c   : > { %1871 = vmatprep.mubr.bf16.mxu0 %v2176_v0 }
 0x291   : > { %2139 = vmatmul.mubr.msk.bf16.vlgmr.msra.gmra.mrb[44].mxu1 %vm381_vm1, %v2167_v7 }
 0x292   : > { %2049 = vmatmul.mubr.msk.bf16.vlgmr.msra.gmra.mrb[44].mxu0 %vm381_vm1, %v2167_v7 }
 0x35c   : > { %v1768_v10 = vpop.f32.mrb[40].mxu1 }
 0x35d   : > { %v1725_v11 = vpop.f32.mrb[40].mxu0  ;;  %v2134_v12 = vpop.f32.mrb[41].mxu1  ;;  %v1769_v0 = vadd.f32 %v1768_v10, %v1667_v8 }
 0x35e   : > { %v1727_v14 = vpop.f32.mrb[41].mxu0  ;;  %v1771_v15 = vpop.f32.mrb[42].mxu1  ;;  %v1726_v18 = vadd.f32 %v1725_v11, %v1667_v8 }
 0x35f   : > { %v1729_v16 = vpop.f32.mrb[42].mxu0  ;;  %v2135_v13 = vpop.f32.mrb[43].mxu1  ;;  %v1728_v21 = vadd.f32 %v1727_v14, %v1667_v8  ;;  %v1772_v22 = vadd.f32 %v1771_v15, %v1672_v9  ;;  %v1777_v27 = vmax.f32 %v1769_v0, 0.0 }
 0x360   : > { %v1731_v17 = vpop.f32.mrb[43].mxu0  ;;  %v1775_v28 = vmax.f32 %v1726_v18, 0.0  ;;  %v1730_v29 = vadd.f32 %v1729_v16, %v1672_v9 }
 0x361   : > { %v1732_v33 = vadd.f32 %v1731_v17, %v1672_v9  ;;  %v1776_v39 = vmax.f32 %v1728_v21, 0.0  ;;  %v1780_v40 = vmax.f32 %v1772_v22, 0.0 }
 0x362   : > { %v1778_v48 = vmax.f32 %v1730_v29, 0.0 }
 0x363   : > { %v1779_v51 = vmax.f32 %v1732_v33, 0.0 }
 0x364   : > { %v1916_v23 = vpop.f32.mrb[44].mxu1 }
 0x365   : > { %v1917_v24 = vadd.f32 %v1916_v23, %v1800_v19  ;;  %v1873_v25 = vpop.f32.mrb[44].mxu0  ;;  %v2140_v26 = vpop.f32.mrb[45].mxu1 }
 0x366   : > { %v1874_v30 = vadd.f32 %v1873_v25, %v1800_v19  ;;  %v1875_v31 = vpop.f32.mrb[45].mxu0  ;;  %v1919_v32 = vpop.f32.mrb[46].mxu1 }
 0x367   : > { %v1925_v34 = vmax.f32 %v1917_v24, 0.0  ;;  %v1876_v35 = vadd.f32 %v1875_v31, %v1800_v19  ;;  %v1920_v36 = vadd.f32 %v1919_v32, %v1805_v20  ;;  %v1877_v37 = vpop.f32.mrb[46].mxu0  ;;  %v2141_v38 = vpop.f32.mrb[47].mxu1 }
 0x368   : > { %v1923_v41 = vmax.f32 %v1874_v30, 0.0  ;;  %v1878_v42 = vadd.f32 %v1877_v37, %v1805_v20  ;;  %v1879_v43 = vpop.f32.mrb[47].mxu0 }
 0x369   : > { %v1931_v44 = vadd.f32 %v1925_v34, %v1777_v27  ;;  %v1924_v45 = vmax.f32 %v1876_v35, 0.0  ;;  %v1928_v46 = vmax.f32 %v1920_v36, 0.0  ;;  %v1880_v47 = vadd.f32 %v1879_v43, %v1805_v20 }
 0x36a   : > { %v1929_v49 = vadd.f32 %v1923_v41, %v1775_v28  ;;  %v1926_v50 = vmax.f32 %v1878_v42, 0.0 }
 0x36b   : > { %1937 = vst [vmem:[%s359_s11 + $0x10] sm:$0xff] %v1931_v44  ;;  %v1930_v52 = vadd.f32 %v1924_v45, %v1776_v39  ;;  %v1934_v53 = vadd.f32 %v1928_v46, %v1780_v40  ;;  %v1927_v54 = vmax.f32 %v1880_v47, 0.0 }
 0x36c   : > { %1935 = vst [vmem:[%s359_s11] sm:$0xff] %v1929_v49  ;;  %v1932_v55 = vadd.f32 %v1926_v50, %v1778_v48 }
 0x36d   : > { %1936 = vst [vmem:[%s359_s11 + $0x8] sm:$0xff] %v1930_v52  ;;  %1940 = vst [vmem:[%s359_s11 + $0x28] sm:$0xff] %v1934_v53  ;;  %v1933_v56 = vadd.f32 %v1927_v54, %v1779_v51 }
 0x36e   : > { %1938 = vst [vmem:[%s359_s11 + $0x18] sm:$0xff] %v1932_v55 }
 0x36f   : > { %1939 = vst [vmem:[%s359_s11 + $0x20] sm:$0xff] %v1933_v56 }
 0x370 PF: > { %s20_s13 = sadd.s32 1, %s2174_s13  }
 0x371   : > { %p17_p4 = scmp.ge.s32.totalorder %s20_s13, 4  }
 0x373   :  { %19 = sbr.rel (!%p17_p4) target bundleno = 1 (0x1), region = 98 }

</bundles_post_ra>
